<compile_context>
chip_gen: v7x
topology: tpu7x:2x2x1
jax: 0.10.0
libtpu: 0.0.40
codegen_flags: <defaults>
</compile_context>

<pallas_src>
import math
from functools import partial

import jax
import jax.numpy as jnp
from jax import lax
from jax.experimental import pallas as pl
from jax.experimental.pallas import tpu as pltpu


_NEG_INF = -1e30                      # finite "-inf": exp/max never see inf-inf NaNs
_VMEM_LIMIT = 32 * 1024 * 1024        # safe on v5e/v6e (128 MiB) and v7x (64 MiB/TC)


def _pick_tile(dim, candidates):
    """Largest candidate tile that evenly divides `dim`, else the full dim."""
    for c in candidates:
        if c <= dim and dim % c == 0:
            return c
    # TODO(synk): dims not divisible by any candidate fall back to a full-dim
    # tile; very large non-divisible dims would need cdiv grids + masked tails
    # instead (VMEM cliff, especially on v7x's 64 MiB/TC).
    return dim


# --------------------------------------------------------------------------
# Tiled linear, NT form:  y = x @ W^T + b
#   x:(M,K) bf16, W:(N,K) bf16 (PyTorch (out,in) layout, NO transpose), b:(1,N)
# --------------------------------------------------------------------------
def _linear_nt_kernel(x_ref, w_ref, b_ref, o_ref, acc_ref):
    @pl.when(pl.program_id(2) == 0)
    def _():
        acc_ref[...] = jnp.zeros_like(acc_ref)

    # NT matmul: contract the K (last) dims of x and W directly on the MXU.
    acc_ref[...] += lax.dot_general(
        x_ref[...], w_ref[...], (((1,), (1,)), ((), ())),
        preferred_element_type=jnp.float32)

    @pl.when(pl.program_id(2) == pl.num_programs(2) - 1)
    def _():
        o_ref[...] = (acc_ref[...] + b_ref[...].astype(jnp.float32)
                      ).astype(o_ref.dtype)


def linear_nt(x2d, w, b):
    """x2d:(M,K) bf16, w:(N,K) bf16, b:(1,N) bf16 -> (M,N) bf16."""
    M, K = x2d.shape
    N, K2 = w.shape
    assert K == K2
    tm = _pick_tile(M, (1024, 512, 256, 128))
    tn = _pick_tile(N, (512, 256, 128))
    tk = _pick_tile(K, (512, 256, 128))
    grid = (M // tm, N // tn, K // tk)

    cost = pl.CostEstimate(
        flops=2 * M * N * K,
        transcendentals=0,
        bytes_accessed=2 * (M * K + N * K + M * N + N))

    return pl.pallas_call(
        _linear_nt_kernel,
        out_shape=jax.ShapeDtypeStruct((M, N), jnp.bfloat16),
        grid_spec=pltpu.PrefetchScalarGridSpec(
            num_scalar_prefetch=0,
            grid=grid,
            in_specs=[
                pl.BlockSpec((tm, tk), lambda i, j, k: (i, k)),   # x tile
                pl.BlockSpec((tn, tk), lambda i, j, k: (j, k)),   # W tile (NT)
                pl.BlockSpec((1, tn), lambda i, j, k: (0, j)),    # bias tile
            ],
            out_specs=pl.BlockSpec((tm, tn), lambda i, j, k: (i, j)),
            scratch_shapes=[pltpu.VMEM((tm, tn), jnp.float32)],
        ),
        compiler_params=pltpu.CompilerParams(
            dimension_semantics=("parallel", "parallel", "arbitrary"),
            vmem_limit_bytes=_VMEM_LIMIT),
        cost_estimate=cost,
    )(x2d, w, b)


# --------------------------------------------------------------------------
# Causal flash attention (online softmax), triangular step enumeration
# --------------------------------------------------------------------------
def _tri_steps(num_q):
    """Flattened lower-triangular (qi, ki) tile enumeration (ki <= qi)."""
    qs, ks = [], []
    for qi in range(num_q):
        for ki in range(qi + 1):
            qs.append(qi)
            ks.append(ki)
    return (jnp.asarray(qs, dtype=jnp.int32), jnp.asarray(ks, dtype=jnp.int32))


def _flash_kernel(qi_ref, ki_ref, q_ref, k_ref, v_ref, o_ref,
                  qs_ref, m_ref, l_ref, acc_ref, *, scale, step_axis):
    step = pl.program_id(step_axis)
    qi = qi_ref[step]
    ki = ki_ref[step]

    @pl.when(ki == 0)
    def _():
        # New q tile: pre-scale q once (tq*D VALU work) instead of scaling the
        # (tq,tk) score tile every kv step; reset the online-softmax state.
        qs_ref[...] = (q_ref[0] * scale).astype(qs_ref.dtype)
        m_ref[...] = jnp.full_like(m_ref, _NEG_INF)
        l_ref[...] = jnp.zeros_like(l_ref)
        acc_ref[...] = jnp.zeros_like(acc_ref)

    def _update(masked):
        q = qs_ref[...]                                # (tq, D) bf16, pre-scaled
        k = k_ref[0]                                   # (tk, D) bf16
        v = v_ref[0]                                   # (tk, D) bf16
        # NT matmul: contract last dims of q and k directly (no k.T relayout).
        s = lax.dot_general(q, k, (((1,), (1,)), ((), ())),
                            preferred_element_type=jnp.float32)   # (tq, tk)
        if masked:
            # Diagonal tile (ki == qi) with tq == tk: constant lower-triangular
            # mask, no q_start/k_start offsets -> hoistable.
            tri = (lax.broadcasted_iota(jnp.int32, s.shape, 0)
                   >= lax.broadcasted_iota(jnp.int32, s.shape, 1))
            s = jnp.where(tri, s, _NEG_INF)
        m_prev = m_ref[...]                            # (tq, 128) lane-dense
        l_prev = l_ref[...]                            # (tq, 128)
        s_max = jnp.max(s, axis=-1, keepdims=True)     # (tq, 1)
        m_next = jnp.maximum(m_prev, s_max)            # (tq, 128)
        alpha = jnp.exp(m_prev - m_next)               # (tq, 128)
        p = jnp.exp(s - m_next[:, 0:1])                # (tq, tk) unnormalized
        l_ref[...] = alpha * l_prev + jnp.sum(p, axis=-1, keepdims=True)
        acc_ref[...] = acc_ref[...] * alpha[:, 0:1] + jnp.dot(
            p.astype(v.dtype), v, preferred_element_type=jnp.float32)
        m_ref[...] = m_next

    # Tile strictly below the causal diagonal: no mask work at all.
    @pl.when(ki != qi)
    def _():
        _update(masked=False)

    # Diagonal tile: masked update + finalize (last kv step for this q tile).
    @pl.when(ki == qi)
    def _():
        _update(masked=True)
        inv_l = pl.reciprocal(l_ref[...], approx=True)            # EUP
        o_ref[0] = (acc_ref[...] * inv_l[:, 0:1]).astype(o_ref.dtype)


def _flash_causal_fused(qkv3, *, B, S, H, D, scale):
    """Causal flash attention reading q/k/v straight from the packed
    (B, S, 3*H*D) QKV tensor ('(three h d)' column order) and writing the
    context directly in (B, S, H*D) '(h d)' layout.  Requires D % 128 == 0 so
    every block is lane-dense."""
    E = H * D
    tq = _pick_tile(S, (256, 128, 64, 32, 16, 8))
    num_q = S // tq
    qi_steps, ki_steps = _tri_steps(num_q)
    n_steps = int(qi_steps.shape[0])

    def q_map(b, h, step, qi_r, ki_r):
        return (b, qi_r[step], h)            # q head h -> column block h

    def k_map(b, h, step, qi_r, ki_r):
        return (b, ki_r[step], H + h)        # k head h -> column block H + h

    def v_map(b, h, step, qi_r, ki_r):
        return (b, ki_r[step], 2 * H + h)    # v head h -> column block 2H + h

    kernel = partial(_flash_kernel, scale=scale, step_axis=2)
    cost = pl.CostEstimate(
        flops=2 * B * H * S * S * D,            # causal-halved QK^T + PV
        transcendentals=B * H * S * S // 2,
        bytes_accessed=2 * 4 * B * S * E)

    return pl.pallas_call(
        kernel,
        out_shape=jax.ShapeDtypeStruct((B, S, E), jnp.bfloat16),
        grid_spec=pltpu.PrefetchScalarGridSpec(
            num_scalar_prefetch=2,
            grid=(B, H, n_steps),
            in_specs=[
                pl.BlockSpec((1, tq, D), q_map),
                pl.BlockSpec((1, tq, D), k_map),
                pl.BlockSpec((1, tq, D), v_map),
            ],
            out_specs=pl.BlockSpec((1, tq, D), q_map),
            scratch_shapes=[
                pltpu.VMEM((tq, D), jnp.bfloat16),    # pre-scaled q
                pltpu.VMEM((tq, 128), jnp.float32),   # m (running max)
                pltpu.VMEM((tq, 128), jnp.float32),   # l (running denom)
                pltpu.VMEM((tq, D), jnp.float32),     # acc (running numerator)
            ],
        ),
        compiler_params=pltpu.CompilerParams(
            dimension_semantics=("parallel", "parallel", "arbitrary"),
            vmem_limit_bytes=_VMEM_LIMIT),
        cost_estimate=cost,
    )(qi_steps, ki_steps, qkv3, qkv3, qkv3)


def _flash_causal_split(q, k, v, *, scale):
    """Fallback for small / non-128-multiple head dims: q,k,v are (B*H, S, D)."""
    BH, S, D = q.shape
    tq = _pick_tile(S, (256, 128, 64, 32, 16, 8))
    num_q = S // tq
    qi_steps, ki_steps = _tri_steps(num_q)
    n_steps = int(qi_steps.shape[0])

    def q_map(bh, step, qi_r, ki_r):
        return (bh, qi_r[step], 0)

    def kv_map(bh, step, qi_r, ki_r):
        return (bh, ki_r[step], 0)

    kernel = partial(_flash_kernel, scale=scale, step_axis=1)
    cost = pl.CostEstimate(
        flops=2 * BH * S * S * D,
        transcendentals=BH * S * S // 2,
        bytes_accessed=2 * 4 * BH * S * D)

    return pl.pallas_call(
        kernel,
        out_shape=jax.ShapeDtypeStruct((BH, S, D), jnp.bfloat16),
        grid_spec=pltpu.PrefetchScalarGridSpec(
            num_scalar_prefetch=2,
            grid=(BH, n_steps),
            in_specs=[
                pl.BlockSpec((1, tq, D), q_map),
                pl.BlockSpec((1, tq, D), kv_map),
                pl.BlockSpec((1, tq, D), kv_map),
            ],
            out_specs=pl.BlockSpec((1, tq, D), q_map),
            scratch_shapes=[
                pltpu.VMEM((tq, D), jnp.bfloat16),    # pre-scaled q
                pltpu.VMEM((tq, 128), jnp.float32),   # m
                pltpu.VMEM((tq, 128), jnp.float32),   # l
                pltpu.VMEM((tq, D), jnp.float32),     # acc
            ],
        ),
        compiler_params=pltpu.CompilerParams(
            dimension_semantics=("parallel", "arbitrary"),
            vmem_limit_bytes=_VMEM_LIMIT),
        cost_estimate=cost,
    )(qi_steps, ki_steps, q, k, v)


# --------------------------------------------------------------------------
# MHA_FA3 forward
# --------------------------------------------------------------------------
def mha_fa3_forward(x, wqkv, bqkv, wout, bout, *, num_heads):
    """x: (B,S,E). wqkv: (3E,E), bqkv: (3E,), wout: (E,E), bout: (E,) in
    PyTorch nn.Linear (out,in) layout.  Returns (B,S,E) bf16 (causal MHA)."""
    B, S, E = x.shape
    H = num_heads
    assert E % H == 0
    D = E // H
    scale = 1.0 / math.sqrt(D)

    x2d = jnp.asarray(x, jnp.bfloat16).reshape(B * S, E)
    wqkv_b = jnp.asarray(wqkv, jnp.bfloat16)               # (3E, E): no transpose
    bqkv_r = jnp.asarray(bqkv, jnp.bfloat16).reshape(1, 3 * E)
    wout_b = jnp.asarray(wout, jnp.bfloat16)               # (E, E): no transpose
    bout_r = jnp.asarray(bout, jnp.bfloat16).reshape(1, E)

    # 1) Fused QKV projection (NT GEMM, f32 accumulation, bf16 out).
    qkv = linear_nt(x2d, wqkv_b, bqkv_r)                   # (B*S, 3E)

    # 2) Causal flash attention.
    if D % 128 == 0:
        # Head split/merge fused into the attention BlockSpecs: read packed qkv
        # column blocks, write '(h d)'-packed context -> no transpose passes.
        ctx2d = _flash_causal_fused(qkv.reshape(B, S, 3 * E),
                                    B=B, S=S, H=H, D=D, scale=scale
                                    ).reshape(B * S, E)
    else:
        # Small / lane-sparse head dims: explicit (B*H, S, D) layout.
        qkv5 = qkv.reshape(B, S, 3, H, D)
        q = qkv5[:, :, 0].transpose(0, 2, 1, 3).reshape(B * H, S, D)
        k = qkv5[:, :, 1].transpose(0, 2, 1, 3).reshape(B * H, S, D)
        v = qkv5[:, :, 2].transpose(0, 2, 1, 3).reshape(B * H, S, D)
        ctx = _flash_causal_split(q, k, v, scale=scale)    # (B*H, S, D)
        ctx2d = ctx.reshape(B, H, S, D).transpose(0, 2, 1, 3).reshape(B * S, E)

    # 3) Output projection.
    out = linear_nt(ctx2d, wout_b, bout_r)
    return out.reshape(B, S, E)


# --------------------------------------------------------------------------
# Pure-JAX reference mirroring the PyTorch forward
# --------------------------------------------------------------------------
def _reference(x, wqkv, bqkv, wout, bout, num_heads):
    B, S, E = x.shape
    H = num_heads
    D = E // H
    xb = x.astype(jnp.bfloat16)
    qkv = (jnp.einsum("bse,oe->bso", xb.astype(jnp.float32),
                      wqkv.astype(jnp.float32)) + bqkv.astype(jnp.float32))
    qkv = qkv.astype(jnp.bfloat16).reshape(B, S, 3, H, D)
    q, k, v = qkv[:, :, 0], qkv[:, :, 1], qkv[:, :, 2]     # (B,S,H,D)
    scale = 1.0 / math.sqrt(D)
    s = jnp.einsum("bqhd,bkhd->bhqk", q.astype(jnp.float32),
                   k.astype(jnp.float32)) * scale
    mask = jnp.tril(jnp.ones((S, S), bool))
    s = jnp.where(mask[None, None], s, -jnp.inf)
    p = jax.nn.softmax(s, axis=-1)
    ctx = jnp.einsum("bhqk,bkhd->bqhd", p, v.astype(jnp.float32))
    ctx = ctx.astype(jnp.bfloat16).reshape(B, S, E)
    out = (jnp.einsum("bse,oe->bso", ctx.astype(jnp.float32),
                      wout.astype(jnp.float32)) + bout.astype(jnp.float32))
    return out.astype(jnp.bfloat16)


if __name__ == "__main__":
    def run_case(B, S, E, H):
        key = jax.random.PRNGKey(0)
        kx, kw1, kb1, kw2, kb2 = jax.random.split(key, 5)
        x = jax.random.normal(kx, (B, S, E), dtype=jnp.float32).astype(jnp.bfloat16)
        bound = 1.0 / math.sqrt(E)
        wqkv = jax.random.uniform(kw1, (3 * E, E), jnp.float32, -bound, bound).astype(jnp.bfloat16)
        bqkv = jax.random.uniform(kb1, (3 * E,), jnp.float32, -bound, bound).astype(jnp.bfloat16)
        wout = jax.random.uniform(kw2, (E, E), jnp.float32, -bound, bound).astype(jnp.bfloat16)
        bout = jax.random.uniform(kb2, (E,), jnp.float32, -bound, bound).astype(jnp.bfloat16)

        fwd = jax.jit(partial(mha_fa3_forward, num_heads=H))
        out = jax.block_until_ready(fwd(x, wqkv, bqkv, wout, bout))
        assert out.shape == (B, S, E) and out.dtype == jnp.bfloat16

        ref = _reference(x, wqkv, bqkv, wout, bout, H)
        err = float(jnp.max(jnp.abs(out.astype(jnp.float32) - ref.astype(jnp.float32))))
        if not err < 5e-2:
            raise AssertionError(
                f"mismatch (B={B},S={S},E={E},H={H}): max abs err = {err}")

    # Small config consistent with the module (embed_dim=32, num_heads=4):
    # D=8 -> lane-sparse fallback (split) attention path.
    run_case(B=2, S=16, E=32, H=4)
    # Lane-dense config: D=128 -> fused packed-qkv path with triangular grid.
    run_case(B=2, S=256, E=512, H=4)

    print("KERNEL_OK")
</pallas_src>

<mosaic_0001>
module attributes {stable_mosaic.version = 11 : i64} {
  func.func @_linear_nt_kernel(%arg0: i32, %arg1: i32, %arg2: i32, %arg3: memref<32x32xbf16, #tpu.memory_space<vmem>>, %arg4: memref<96x32xbf16, #tpu.memory_space<vmem>>, %arg5: memref<1x96xbf16, #tpu.memory_space<vmem>>, %arg6: memref<32x96xbf16, #tpu.memory_space<vmem>>, %arg7: memref<32x96xf32, #tpu.memory_space<vmem>>) attributes {dimension_semantics = [#tpu.dimension_semantics<parallel>, #tpu.dimension_semantics<parallel>, #tpu.dimension_semantics<arbitrary>], iteration_bounds = array<i64: 1, 1, 1>, scalar_prefetch = 0 : i64, scratch_operands = 1 : i64, tpu.core_type = #tpu.core_type<tc>, window_params = [{transform_indices = @transform_0, window_bounds = array<i64: 32, 32>}, {transform_indices = @transform_1, window_bounds = array<i64: 96, 32>}, {transform_indices = @transform_2, window_bounds = array<i64: 1, 96>}, {transform_indices = @transform_3, window_bounds = array<i64: 32, 96>}]} {
    %c0_i32 = arith.constant 0 : i32
    %0 = arith.cmpi eq, %arg2, %c0_i32 : i32
    %1 = arith.extui %0 : i1 to i32
    %c0_i32_0 = arith.constant 0 : i32
    %2 = arith.cmpi ne, %1, %c0_i32_0 : i32
    scf.if %2 {
      %cst_10 = arith.constant 0.000000e+00 : f32
      %12 = vector.broadcast %cst_10 : f32 to vector<32x96xf32>
      %c0_11 = arith.constant 0 : index
      %c0_12 = arith.constant 0 : index
      %13 = vector.load %arg7[%c0_11, %c0_12] : memref<32x96xf32, #tpu.memory_space<vmem>>, vector<32x96xf32>
      tpu.vector_store %arg7[%c0_11, %c0_12], %12 {strides = array<i32>} : memref<32x96xf32, #tpu.memory_space<vmem>>, vector<32x96xf32>,
    } else {
    }
    %c0 = arith.constant 0 : index
    %c0_1 = arith.constant 0 : index
    %3 = vector.load %arg7[%c0, %c0_1] : memref<32x96xf32, #tpu.memory_space<vmem>>, vector<32x96xf32>
    %c0_2 = arith.constant 0 : index
    %c0_3 = arith.constant 0 : index
    %4 = vector.load %arg3[%c0_2, %c0_3] : memref<32x32xbf16, #tpu.memory_space<vmem>>, vector<32x32xbf16>
    %c0_4 = arith.constant 0 : index
    %c0_5 = arith.constant 0 : index
    %5 = vector.load %arg4[%c0_4, %c0_5] : memref<96x32xbf16, #tpu.memory_space<vmem>>, vector<96x32xbf16>
    %cst = arith.constant dense<0.000000e+00> : vector<32x96xf32>
    %6 = tpu.matmul %4, %5, %cst {dimension_numbers = #tpu.dot_dimension_numbers<[1], [1], [0], [0], [0, 0, 1, 0], [], []>} : vector<32x32xbf16>, vector<96x32xbf16>, vector<32x96xf32> -> vector<32x96xf32>
    %7 = arith.addf %3, %6 : vector<32x96xf32>
    %c0_6 = arith.constant 0 : index
    %c0_7 = arith.constant 0 : index
    %8 = vector.load %arg7[%c0_6, %c0_7] : memref<32x96xf32, #tpu.memory_space<vmem>>, vector<32x96xf32>
    tpu.vector_store %arg7[%c0_6, %c0_7], %7 {strides = array<i32>} : memref<32x96xf32, #tpu.memory_space<vmem>>, vector<32x96xf32>,
    %c0_i32_8 = arith.constant 0 : i32
    %9 = arith.cmpi eq, %arg2, %c0_i32_8 : i32
    %10 = arith.extui %9 : i1 to i32
    %c0_i32_9 = arith.constant 0 : i32
    %11 = arith.cmpi ne, %10, %c0_i32_9 : i32
    scf.if %11 {
      %c0_10 = arith.constant 0 : index
      %c0_11 = arith.constant 0 : index
      %12 = vector.load %arg7[%c0_10, %c0_11] : memref<32x96xf32, #tpu.memory_space<vmem>>, vector<32x96xf32>
      %c0_12 = arith.constant 0 : index
      %c0_13 = arith.constant 0 : index
      %13 = vector.load %arg5[%c0_12, %c0_13] : memref<1x96xbf16, #tpu.memory_space<vmem>>, vector<1x96xbf16>
      %14 = arith.extf %13 : vector<1x96xbf16> to vector<1x96xf32>
      %15 = vector.broadcast %14 : vector<1x96xf32> to vector<32x96xf32>
      %16 = arith.addf %12, %15 : vector<32x96xf32>
      %17 = arith.truncf %16 : vector<32x96xf32> to vector<32x96xbf16>
      %c0_14 = arith.constant 0 : index
      %c0_15 = arith.constant 0 : index
      %18 = vector.load %arg6[%c0_14, %c0_15] : memref<32x96xbf16, #tpu.memory_space<vmem>>, vector<32x96xbf16>
      tpu.vector_store %arg6[%c0_14, %c0_15], %17 {strides = array<i32>} : memref<32x96xbf16, #tpu.memory_space<vmem>>, vector<32x96xbf16>,
    } else {
    }
    return
  }
  func.func @transform_0(%arg0: i32, %arg1: i32, %arg2: i32) -> (i32, i32) {
    %c0_i32 = arith.constant 0 : i32
    return %arg0, %arg2 : i32, i32
  }
  func.func @transform_1(%arg0: i32, %arg1: i32, %arg2: i32) -> (i32, i32) {
    %c0_i32 = arith.constant 0 : i32
    return %arg1, %arg2 : i32, i32
  }
  func.func @transform_2(%arg0: i32, %arg1: i32, %arg2: i32) -> (i32, i32) {
    %c0_i32 = arith.constant 0 : i32
    %c0_i32_0 = arith.constant 0 : i32
    return %c0_i32, %arg1 : i32, i32
  }
  func.func @transform_3(%arg0: i32, %arg1: i32, %arg2: i32) -> (i32, i32) {
    %c0_i32 = arith.constant 0 : i32
    return %arg0, %arg1 : i32, i32
  }
}

module attributes {stable_mosaic.version = 11 : i64} {
  func.func @_flash_kernel(%arg0: i32, %arg1: i32, %arg2: memref<1xi32, #tpu.memory_space<smem>>, %arg3: memref<1xi32, #tpu.memory_space<smem>>, %arg4: memref<1x16x8xbf16, #tpu.memory_space<vmem>>, %arg5: memref<1x16x8xbf16, #tpu.memory_space<vmem>>, %arg6: memref<1x16x8xbf16, #tpu.memory_space<vmem>>, %arg7: memref<1x16x8xbf16, #tpu.memory_space<vmem>>, %arg8: memref<16x8xbf16, #tpu.memory_space<vmem>>, %arg9: memref<16x128xf32, #tpu.memory_space<vmem>>, %arg10: memref<16x128xf32, #tpu.memory_space<vmem>>, %arg11: memref<16x8xf32, #tpu.memory_space<vmem>>) attributes {dimension_semantics = [#tpu.dimension_semantics<parallel>, #tpu.dimension_semantics<arbitrary>], iteration_bounds = array<i64: 8, 1>, scalar_prefetch = 2 : i64, scratch_operands = 4 : i64, tpu.core_type = #tpu.core_type<tc>, window_params = [{transform_indices = @transform_0, window_bounds = array<i64: 1, 16, 8>}, {transform_indices = @transform_1, window_bounds = array<i64: 1, 16, 8>}, {transform_indices = @transform_2, window_bounds = array<i64: 1, 16, 8>}, {transform_indices = @transform_3, window_bounds = array<i64: 1, 16, 8>}]} {
    %0 = arith.index_cast %arg1 : i32 to index
    %1 = memref.load %arg2[%0] : memref<1xi32, #tpu.memory_space<smem>>
    %2 = arith.index_cast %arg1 : i32 to index
    %3 = memref.load %arg3[%2] : memref<1xi32, #tpu.memory_space<smem>>
    %c0_i32 = arith.constant 0 : i32
    %4 = arith.cmpi eq, %3, %c0_i32 : i32
    %5 = arith.extui %4 : i1 to i32
    %c0_i32_0 = arith.constant 0 : i32
    %6 = arith.cmpi ne, %5, %c0_i32_0 : i32
    scf.if %6 {
      %c0 = arith.constant 0 : index
      %c0_3 = arith.constant 0 : index
      %c0_4 = arith.constant 0 : index
      %13 = vector.load %arg4[%c0, %c0_3, %c0_4] : memref<1x16x8xbf16, #tpu.memory_space<vmem>>, vector<1x16x8xbf16>
      %14 = vector.shape_cast %13 : vector<1x16x8xbf16> to vector<16x8xbf16>
      %cst = arith.constant 3.535160e-01 : bf16
      %15 = vector.broadcast %cst : bf16 to vector<16x8xbf16>
      %16 = arith.mulf %14, %15 : vector<16x8xbf16>
      %c0_5 = arith.constant 0 : index
      %c0_6 = arith.constant 0 : index
      %17 = vector.load %arg8[%c0_5, %c0_6] : memref<16x8xbf16, #tpu.memory_space<vmem>>, vector<16x8xbf16>
      tpu.vector_store %arg8[%c0_5, %c0_6], %16 {strides = array<i32>} : memref<16x8xbf16, #tpu.memory_space<vmem>>, vector<16x8xbf16>,
      %cst_7 = arith.constant -1.000000e+30 : f32
      %18 = vector.broadcast %cst_7 : f32 to vector<16x128xf32>
      %c0_8 = arith.constant 0 : index
      %c0_9 = arith.constant 0 : index
      %19 = vector.load %arg9[%c0_8, %c0_9] : memref<16x128xf32, #tpu.memory_space<vmem>>, vector<16x128xf32>
      tpu.vector_store %arg9[%c0_8, %c0_9], %18 {strides = array<i32>} : memref<16x128xf32, #tpu.memory_space<vmem>>, vector<16x128xf32>,
      %cst_10 = arith.constant 0.000000e+00 : f32
      %20 = vector.broadcast %cst_10 : f32 to vector<16x128xf32>
      %c0_11 = arith.constant 0 : index
      %c0_12 = arith.constant 0 : index
      %21 = vector.load %arg10[%c0_11, %c0_12] : memref<16x128xf32, #tpu.memory_space<vmem>>, vector<16x128xf32>
      tpu.vector_store %arg10[%c0_11, %c0_12], %20 {strides = array<i32>} : memref<16x128xf32, #tpu.memory_space<vmem>>, vector<16x128xf32>,
      %cst_13 = arith.constant 0.000000e+00 : f32
      %22 = vector.broadcast %cst_13 : f32 to vector<16x8xf32>
      %c0_14 = arith.constant 0 : index
      %c0_15 = arith.constant 0 : index
      %23 = vector.load %arg11[%c0_14, %c0_15] : memref<16x8xf32, #tpu.memory_space<vmem>>, vector<16x8xf32>
      tpu.vector_store %arg11[%c0_14, %c0_15], %22 {strides = array<i32>} : memref<16x8xf32, #tpu.memory_space<vmem>>, vector<16x8xf32>,
    } else {
    }
    %7 = arith.cmpi ne, %3, %1 : i32
    %8 = arith.extui %7 : i1 to i32
    %c0_i32_1 = arith.constant 0 : i32
    %9 = arith.cmpi ne, %8, %c0_i32_1 : i32
    scf.if %9 {
      %c0 = arith.constant 0 : index
      %c0_3 = arith.constant 0 : index
      %13 = vector.load %arg8[%c0, %c0_3] : memref<16x8xbf16, #tpu.memory_space<vmem>>, vector<16x8xbf16>
      %c0_4 = arith.constant 0 : index
      %c0_5 = arith.constant 0 : index
      %c0_6 = arith.constant 0 : index
      %14 = vector.load %arg5[%c0_4, %c0_5, %c0_6] : memref<1x16x8xbf16, #tpu.memory_space<vmem>>, vector<1x16x8xbf16>
      %15 = vector.shape_cast %14 : vector<1x16x8xbf16> to vector<16x8xbf16>
      %c0_7 = arith.constant 0 : index
      %c0_8 = arith.constant 0 : index
      %c0_9 = arith.constant 0 : index
      %16 = vector.load %arg6[%c0_7, %c0_8, %c0_9] : memref<1x16x8xbf16, #tpu.memory_space<vmem>>, vector<1x16x8xbf16>
      %17 = vector.shape_cast %16 : vector<1x16x8xbf16> to vector<16x8xbf16>
      %cst = arith.constant dense<0.000000e+00> : vector<16x16xf32>
      %18 = tpu.matmul %13, %15, %cst {dimension_numbers = #tpu.dot_dimension_numbers<[1], [1], [0], [0], [0, 0, 1, 0], [], []>} : vector<16x8xbf16>, vector<16x8xbf16>, vector<16x16xf32> -> vector<16x16xf32>
      %c0_10 = arith.constant 0 : index
      %c0_11 = arith.constant 0 : index
      %19 = vector.load %arg9[%c0_10, %c0_11] : memref<16x128xf32, #tpu.memory_space<vmem>>, vector<16x128xf32>
      %c0_12 = arith.constant 0 : index
      %c0_13 = arith.constant 0 : index
      %20 = vector.load %arg10[%c0_12, %c0_13] : memref<16x128xf32, #tpu.memory_space<vmem>>, vector<16x128xf32>
      %cst_14 = arith.constant dense<0xFF800000> : vector<16xf32>
      %21 = vector.multi_reduction <maximumf>, %18, %cst_14 [1] : vector<16x16xf32> to vector<16xf32>
      %22 = vector.shape_cast %21 : vector<16xf32> to vector<16x1xf32>
      %23 = vector.broadcast %22 : vector<16x1xf32> to vector<16x128xf32>
      %24 = arith.maximumf %19, %23 : vector<16x128xf32>
      %25 = arith.subf %19, %24 : vector<16x128xf32>
      %26 = math.exp %25 : vector<16x128xf32>
      %27 = vector.extract_strided_slice %24 {offsets = [0, 0], sizes = [16, 1], strides = [1, 1]} : vector<16x128xf32> to vector<16x1xf32>
      %28 = vector.broadcast %27 : vector<16x1xf32> to vector<16x16xf32>
      %29 = arith.subf %18, %28 : vector<16x16xf32>
      %30 = math.exp %29 : vector<16x16xf32>
      %31 = arith.mulf %26, %20 : vector<16x128xf32>
      %cst_15 = arith.constant dense<0.000000e+00> : vector<16xf32>
      %32 = vector.multi_reduction <add>, %30, %cst_15 [1] : vector<16x16xf32> to vector<16xf32>
      %33 = vector.shape_cast %32 : vector<16xf32> to vector<16x1xf32>
      %34 = vector.broadcast %33 : vector<16x1xf32> to vector<16x128xf32>
      %35 = arith.addf %31, %34 : vector<16x128xf32>
      %c0_16 = arith.constant 0 : index
      %c0_17 = arith.constant 0 : index
      %36 = vector.load %arg10[%c0_16, %c0_17] : memref<16x128xf32, #tpu.memory_space<vmem>>, vector<16x128xf32>
      tpu.vector_store %arg10[%c0_16, %c0_17], %35 {strides = array<i32>} : memref<16x128xf32, #tpu.memory_space<vmem>>, vector<16x128xf32>,
      %c0_18 = arith.constant 0 : index
      %c0_19 = arith.constant 0 : index
      %37 = vector.load %arg11[%c0_18, %c0_19] : memref<16x8xf32, #tpu.memory_space<vmem>>, vector<16x8xf32>
      %38 = vector.extract_strided_slice %26 {offsets = [0, 0], sizes = [16, 1], strides = [1, 1]} : vector<16x128xf32> to vector<16x1xf32>
      %39 = vector.broadcast %38 : vector<16x1xf32> to vector<16x8xf32>
      %40 = arith.mulf %37, %39 : vector<16x8xf32>
      %41 = arith.truncf %30 : vector<16x16xf32> to vector<16x16xbf16>
      %cst_20 = arith.constant dense<0.000000e+00> : vector<16x8xf32>
      %42 = tpu.matmul %41, %17, %cst_20 {dimension_numbers = #tpu.dot_dimension_numbers<[1], [0], [0], [1], [0, 0, 1, 1], [], []>} : vector<16x16xbf16>, vector<16x8xbf16>, vector<16x8xf32> -> vector<16x8xf32>
      %43 = arith.addf %40, %42 : vector<16x8xf32>
      %c0_21 = arith.constant 0 : index
      %c0_22 = arith.constant 0 : index
      %44 = vector.load %arg11[%c0_21, %c0_22] : memref<16x8xf32, #tpu.memory_space<vmem>>, vector<16x8xf32>
      tpu.vector_store %arg11[%c0_21, %c0_22], %43 {strides = array<i32>} : memref<16x8xf32, #tpu.memory_space<vmem>>, vector<16x8xf32>,
      %c0_23 = arith.constant 0 : index
      %c0_24 = arith.constant 0 : index
      %45 = vector.load %arg9[%c0_23, %c0_24] : memref<16x128xf32, #tpu.memory_space<vmem>>, vector<16x128xf32>
      tpu.vector_store %arg9[%c0_23, %c0_24], %24 {strides = array<i32>} : memref<16x128xf32, #tpu.memory_space<vmem>>, vector<16x128xf32>,
    } else {
    }
    %10 = arith.cmpi eq, %3, %1 : i32
    %11 = arith.extui %10 : i1 to i32
    %c0_i32_2 = arith.constant 0 : i32
    %12 = arith.cmpi ne, %11, %c0_i32_2 : i32
    scf.if %12 {
      %c0 = arith.constant 0 : index
      %c0_3 = arith.constant 0 : index
      %13 = vector.load %arg8[%c0, %c0_3] : memref<16x8xbf16, #tpu.memory_space<vmem>>, vector<16x8xbf16>
      %c0_4 = arith.constant 0 : index
      %c0_5 = arith.constant 0 : index
      %c0_6 = arith.constant 0 : index
      %14 = vector.load %arg5[%c0_4, %c0_5, %c0_6] : memref<1x16x8xbf16, #tpu.memory_space<vmem>>, vector<1x16x8xbf16>
      %15 = vector.shape_cast %14 : vector<1x16x8xbf16> to vector<16x8xbf16>
      %c0_7 = arith.constant 0 : index
      %c0_8 = arith.constant 0 : index
      %c0_9 = arith.constant 0 : index
      %16 = vector.load %arg6[%c0_7, %c0_8, %c0_9] : memref<1x16x8xbf16, #tpu.memory_space<vmem>>, vector<1x16x8xbf16>
      %17 = vector.shape_cast %16 : vector<1x16x8xbf16> to vector<16x8xbf16>
      %cst = arith.constant dense<0.000000e+00> : vector<16x16xf32>
      %18 = tpu.matmul %13, %15, %cst {dimension_numbers = #tpu.dot_dimension_numbers<[1], [1], [0], [0], [0, 0, 1, 0], [], []>} : vector<16x8xbf16>, vector<16x8xbf16>, vector<16x16xf32> -> vector<16x16xf32>
      %19 = tpu.iota {dimensions = array<i32: 0>} : vector<16x16xi32>
      %20 = tpu.iota {dimensions = array<i32: 1>} : vector<16x16xi32>
      %21 = arith.cmpi sge, %19, %20 : vector<16x16xi32>
      %cst_10 = arith.constant -1.000000e+30 : f32
      %22 = vector.broadcast %cst_10 : f32 to vector<16x16xf32>
      %23 = arith.select %21, %18, %22 : vector<16x16xi1>, vector<16x16xf32>
      %c0_11 = arith.constant 0 : index
      %c0_12 = arith.constant 0 : index
      %24 = vector.load %arg9[%c0_11, %c0_12] : memref<16x128xf32, #tpu.memory_space<vmem>>, vector<16x128xf32>
      %c0_13 = arith.constant 0 : index
      %c0_14 = arith.constant 0 : index
      %25 = vector.load %arg10[%c0_13, %c0_14] : memref<16x128xf32, #tpu.memory_space<vmem>>, vector<16x128xf32>
      %cst_15 = arith.constant dense<0xFF800000> : vector<16xf32>
      %26 = vector.multi_reduction <maximumf>, %23, %cst_15 [1] : vector<16x16xf32> to vector<16xf32>
      %27 = vector.shape_cast %26 : vector<16xf32> to vector<16x1xf32>
      %28 = vector.broadcast %27 : vector<16x1xf32> to vector<16x128xf32>
      %29 = arith.maximumf %24, %28 : vector<16x128xf32>
      %30 = arith.subf %24, %29 : vector<16x128xf32>
      %31 = math.exp %30 : vector<16x128xf32>
      %32 = vector.extract_strided_slice %29 {offsets = [0, 0], sizes = [16, 1], strides = [1, 1]} : vector<16x128xf32> to vector<16x1xf32>
      %33 = vector.broadcast %32 : vector<16x1xf32> to vector<16x16xf32>
      %34 = arith.subf %23, %33 : vector<16x16xf32>
      %35 = math.exp %34 : vector<16x16xf32>
      %36 = arith.mulf %31, %25 : vector<16x128xf32>
      %cst_16 = arith.constant dense<0.000000e+00> : vector<16xf32>
      %37 = vector.multi_reduction <add>, %35, %cst_16 [1] : vector<16x16xf32> to vector<16xf32>
      %38 = vector.shape_cast %37 : vector<16xf32> to vector<16x1xf32>
      %39 = vector.broadcast %38 : vector<16x1xf32> to vector<16x128xf32>
      %40 = arith.addf %36, %39 : vector<16x128xf32>
      %c0_17 = arith.constant 0 : index
      %c0_18 = arith.constant 0 : index
      %41 = vector.load %arg10[%c0_17, %c0_18] : memref<16x128xf32, #tpu.memory_space<vmem>>, vector<16x128xf32>
      tpu.vector_store %arg10[%c0_17, %c0_18], %40 {strides = array<i32>} : memref<16x128xf32, #tpu.memory_space<vmem>>, vector<16x128xf32>,
      %c0_19 = arith.constant 0 : index
      %c0_20 = arith.constant 0 : index
      %42 = vector.load %arg11[%c0_19, %c0_20] : memref<16x8xf32, #tpu.memory_space<vmem>>, vector<16x8xf32>
      %43 = vector.extract_strided_slice %31 {offsets = [0, 0], sizes = [16, 1], strides = [1, 1]} : vector<16x128xf32> to vector<16x1xf32>
      %44 = vector.broadcast %43 : vector<16x1xf32> to vector<16x8xf32>
      %45 = arith.mulf %42, %44 : vector<16x8xf32>
      %46 = arith.truncf %35 : vector<16x16xf32> to vector<16x16xbf16>
      %cst_21 = arith.constant dense<0.000000e+00> : vector<16x8xf32>
      %47 = tpu.matmul %46, %17, %cst_21 {dimension_numbers = #tpu.dot_dimension_numbers<[1], [0], [0], [1], [0, 0, 1, 1], [], []>} : vector<16x16xbf16>, vector<16x8xbf16>, vector<16x8xf32> -> vector<16x8xf32>
      %48 = arith.addf %45, %47 : vector<16x8xf32>
      %c0_22 = arith.constant 0 : index
      %c0_23 = arith.constant 0 : index
      %49 = vector.load %arg11[%c0_22, %c0_23] : memref<16x8xf32, #tpu.memory_space<vmem>>, vector<16x8xf32>
      tpu.vector_store %arg11[%c0_22, %c0_23], %48 {strides = array<i32>} : memref<16x8xf32, #tpu.memory_space<vmem>>, vector<16x8xf32>,
      %c0_24 = arith.constant 0 : index
      %c0_25 = arith.constant 0 : index
      %50 = vector.load %arg9[%c0_24, %c0_25] : memref<16x128xf32, #tpu.memory_space<vmem>>, vector<16x128xf32>
      tpu.vector_store %arg9[%c0_24, %c0_25], %29 {strides = array<i32>} : memref<16x128xf32, #tpu.memory_space<vmem>>, vector<16x128xf32>,
      %c0_26 = arith.constant 0 : index
      %c0_27 = arith.constant 0 : index
      %51 = vector.load %arg10[%c0_26, %c0_27] : memref<16x128xf32, #tpu.memory_space<vmem>>, vector<16x128xf32>
      %52 = tpu.reciprocal %51 {approx = true} : vector<16x128xf32> -> vector<16x128xf32>
      %c0_28 = arith.constant 0 : index
      %c0_29 = arith.constant 0 : index
      %53 = vector.load %arg11[%c0_28, %c0_29] : memref<16x8xf32, #tpu.memory_space<vmem>>, vector<16x8xf32>
      %54 = vector.extract_strided_slice %52 {offsets = [0, 0], sizes = [16, 1], strides = [1, 1]} : vector<16x128xf32> to vector<16x1xf32>
      %55 = vector.broadcast %54 : vector<16x1xf32> to vector<16x8xf32>
      %56 = arith.mulf %53, %55 : vector<16x8xf32>
      %57 = arith.truncf %56 : vector<16x8xf32> to vector<16x8xbf16>
      %c0_30 = arith.constant 0 : index
      %c0_31 = arith.constant 0 : index
      %c0_32 = arith.constant 0 : index
      %58 = vector.load %arg7[%c0_30, %c0_31, %c0_32] : memref<1x16x8xbf16, #tpu.memory_space<vmem>>, vector<1x16x8xbf16>
      %59 = vector.shape_cast %58 : vector<1x16x8xbf16> to vector<16x8xbf16>
      %60 = vector.shape_cast %57 : vector<16x8xbf16> to vector<1x16x8xbf16>
      tpu.vector_store %arg7[%c0_30, %c0_31, %c0_32], %60 {strides = array<i32>} : memref<1x16x8xbf16, #tpu.memory_space<vmem>>, vector<1x16x8xbf16>,
    } else {
    }
    return
  }
  func.func @transform_0(%arg0: i32, %arg1: i32, %arg2: memref<1xi32, #tpu.memory_space<smem>>, %arg3: memref<1xi32, #tpu.memory_space<smem>>) -> (i32, i32, i32) {
    %0 = arith.index_cast %arg1 : i32 to index
    %1 = memref.load %arg2[%0] : memref<1xi32, #tpu.memory_space<smem>>
    %c0_i32 = arith.constant 0 : i32
    %c0_i32_0 = arith.constant 0 : i32
    return %arg0, %1, %c0_i32 : i32, i32, i32
  }
  func.func @transform_1(%arg0: i32, %arg1: i32, %arg2: memref<1xi32, #tpu.memory_space<smem>>, %arg3: memref<1xi32, #tpu.memory_space<smem>>) -> (i32, i32, i32) {
    %0 = arith.index_cast %arg1 : i32 to index
    %1 = memref.load %arg3[%0] : memref<1xi32, #tpu.memory_space<smem>>
    %c0_i32 = arith.constant 0 : i32
    %c0_i32_0 = arith.constant 0 : i32
    return %arg0, %1, %c0_i32 : i32, i32, i32
  }
  func.func @transform_2(%arg0: i32, %arg1: i32, %arg2: memref<1xi32, #tpu.memory_space<smem>>, %arg3: memref<1xi32, #tpu.memory_space<smem>>) -> (i32, i32, i32) {
    %0 = arith.index_cast %arg1 : i32 to index
    %1 = memref.load %arg3[%0] : memref<1xi32, #tpu.memory_space<smem>>
    %c0_i32 = arith.constant 0 : i32
    %c0_i32_0 = arith.constant 0 : i32
    return %arg0, %1, %c0_i32 : i32, i32, i32
  }
  func.func @transform_3(%arg0: i32, %arg1: i32, %arg2: memref<1xi32, #tpu.memory_space<smem>>, %arg3: memref<1xi32, #tpu.memory_space<smem>>) -> (i32, i32, i32) {
    %0 = arith.index_cast %arg1 : i32 to index
    %1 = memref.load %arg2[%0] : memref<1xi32, #tpu.memory_space<smem>>
    %c0_i32 = arith.constant 0 : i32
    %c0_i32_0 = arith.constant 0 : i32
    return %arg0, %1, %c0_i32 : i32, i32, i32
  }
}

module attributes {stable_mosaic.version = 11 : i64} {
  func.func @_linear_nt_kernel(%arg0: i32, %arg1: i32, %arg2: i32, %arg3: memref<32x32xbf16, #tpu.memory_space<vmem>>, %arg4: memref<32x32xbf16, #tpu.memory_space<vmem>>, %arg5: memref<1x32xbf16, #tpu.memory_space<vmem>>, %arg6: memref<32x32xbf16, #tpu.memory_space<vmem>>, %arg7: memref<32x32xf32, #tpu.memory_space<vmem>>) attributes {dimension_semantics = [#tpu.dimension_semantics<parallel>, #tpu.dimension_semantics<parallel>, #tpu.dimension_semantics<arbitrary>], iteration_bounds = array<i64: 1, 1, 1>, scalar_prefetch = 0 : i64, scratch_operands = 1 : i64, tpu.core_type = #tpu.core_type<tc>, window_params = [{transform_indices = @transform_0, window_bounds = array<i64: 32, 32>}, {transform_indices = @transform_1, window_bounds = array<i64: 32, 32>}, {transform_indices = @transform_2, window_bounds = array<i64: 1, 32>}, {transform_indices = @transform_3, window_bounds = array<i64: 32, 32>}]} {
    %c0_i32 = arith.constant 0 : i32
    %0 = arith.cmpi eq, %arg2, %c0_i32 : i32
    %1 = arith.extui %0 : i1 to i32
    %c0_i32_0 = arith.constant 0 : i32
    %2 = arith.cmpi ne, %1, %c0_i32_0 : i32
    scf.if %2 {
      %cst_10 = arith.constant 0.000000e+00 : f32
      %12 = vector.broadcast %cst_10 : f32 to vector<32x32xf32>
      %c0_11 = arith.constant 0 : index
      %c0_12 = arith.constant 0 : index
      %13 = vector.load %arg7[%c0_11, %c0_12] : memref<32x32xf32, #tpu.memory_space<vmem>>, vector<32x32xf32>
      tpu.vector_store %arg7[%c0_11, %c0_12], %12 {strides = array<i32>} : memref<32x32xf32, #tpu.memory_space<vmem>>, vector<32x32xf32>,
    } else {
    }
    %c0 = arith.constant 0 : index
    %c0_1 = arith.constant 0 : index
    %3 = vector.load %arg7[%c0, %c0_1] : memref<32x32xf32, #tpu.memory_space<vmem>>, vector<32x32xf32>
    %c0_2 = arith.constant 0 : index
    %c0_3 = arith.constant 0 : index
    %4 = vector.load %arg3[%c0_2, %c0_3] : memref<32x32xbf16, #tpu.memory_space<vmem>>, vector<32x32xbf16>
    %c0_4 = arith.constant 0 : index
    %c0_5 = arith.constant 0 : index
    %5 = vector.load %arg4[%c0_4, %c0_5] : memref<32x32xbf16, #tpu.memory_space<vmem>>, vector<32x32xbf16>
    %cst = arith.constant dense<0.000000e+00> : vector<32x32xf32>
    %6 = tpu.matmul %4, %5, %cst {dimension_numbers = #tpu.dot_dimension_numbers<[1], [1], [0], [0], [0, 0, 1, 0], [], []>} : vector<32x32xbf16>, vector<32x32xbf16>, vector<32x32xf32> -> vector<32x32xf32>
    %7 = arith.addf %3, %6 : vector<32x32xf32>
    %c0_6 = arith.constant 0 : index
    %c0_7 = arith.constant 0 : index
    %8 = vector.load %arg7[%c0_6, %c0_7] : memref<32x32xf32, #tpu.memory_space<vmem>>, vector<32x32xf32>
    tpu.vector_store %arg7[%c0_6, %c0_7], %7 {strides = array<i32>} : memref<32x32xf32, #tpu.memory_space<vmem>>, vector<32x32xf32>,
    %c0_i32_8 = arith.constant 0 : i32
    %9 = arith.cmpi eq, %arg2, %c0_i32_8 : i32
    %10 = arith.extui %9 : i1 to i32
    %c0_i32_9 = arith.constant 0 : i32
    %11 = arith.cmpi ne, %10, %c0_i32_9 : i32
    scf.if %11 {
      %c0_10 = arith.constant 0 : index
      %c0_11 = arith.constant 0 : index
      %12 = vector.load %arg7[%c0_10, %c0_11] : memref<32x32xf32, #tpu.memory_space<vmem>>, vector<32x32xf32>
      %c0_12 = arith.constant 0 : index
      %c0_13 = arith.constant 0 : index
      %13 = vector.load %arg5[%c0_12, %c0_13] : memref<1x32xbf16, #tpu.memory_space<vmem>>, vector<1x32xbf16>
      %14 = arith.extf %13 : vector<1x32xbf16> to vector<1x32xf32>
      %15 = vector.broadcast %14 : vector<1x32xf32> to vector<32x32xf32>
      %16 = arith.addf %12, %15 : vector<32x32xf32>
      %17 = arith.truncf %16 : vector<32x32xf32> to vector<32x32xbf16>
      %c0_14 = arith.constant 0 : index
      %c0_15 = arith.constant 0 : index
      %18 = vector.load %arg6[%c0_14, %c0_15] : memref<32x32xbf16, #tpu.memory_space<vmem>>, vector<32x32xbf16>
      tpu.vector_store %arg6[%c0_14, %c0_15], %17 {strides = array<i32>} : memref<32x32xbf16, #tpu.memory_space<vmem>>, vector<32x32xbf16>,
    } else {
    }
    return
  }
  func.func @transform_0(%arg0: i32, %arg1: i32, %arg2: i32) -> (i32, i32) {
    %c0_i32 = arith.constant 0 : i32
    return %arg0, %arg2 : i32, i32
  }
  func.func @transform_1(%arg0: i32, %arg1: i32, %arg2: i32) -> (i32, i32) {
    %c0_i32 = arith.constant 0 : i32
    return %arg1, %arg2 : i32, i32
  }
  func.func @transform_2(%arg0: i32, %arg1: i32, %arg2: i32) -> (i32, i32) {
    %c0_i32 = arith.constant 0 : i32
    %c0_i32_0 = arith.constant 0 : i32
    return %c0_i32, %arg1 : i32, i32
  }
  func.func @transform_3(%arg0: i32, %arg1: i32, %arg2: i32) -> (i32, i32) {
    %c0_i32 = arith.constant 0 : i32
    return %arg0, %arg1 : i32, i32
  }
}

</mosaic_0001>

<bundles_post_ra>
// kernel: mha_fa3_forward.3
= control target key start
LH: loop header
LB: loop body
LE: loop exit
PB: predicated region body
PF: predicated region fallthrough
CT: control target
= control target key end

     0   :  { %vm84_vm0 = vcmask 261120   ;;  %vm19_vm1 = vcmask 785408   ;;  %v266_v1 = vmov 0.0   ;;  %v176_v15 = vlaneseq  ;;  %s348_s1 = inlined_call_operand.vmem [shape: bf16[96,32], index: 1, kind: input, shape index: {}]   ;;  %s349_s0 = inlined_call_operand.vmem [shape: bf16[32,32], index: 0, kind: input, shape index: {}]   ;;  %s350_s2 = inlined_call_operand.vmem [shape: bf16[1,96], index: 2, kind: input, shape index: {}]   ;;  %s351_s3 = inlined_call_operand.vmem [shape: bf16[32,96], index: 3, kind: output, shape index: {}]  }
   0x1   :  { %v258_v0 = vld [vmem:[%s348_s1] sm:$0xff]   ;;  %22 = vst.msk [vmem:[#allocation2 + $0x10] sm:$0xff] %vm19_vm1, %v266_v1  ;;  %20 = vst.msk [vmem:[#allocation2] sm:$0xff] %vm19_vm1, %v266_v1  ;;  %v259_v2 = vld [vmem:[%s348_s1 + $0x8] sm:$0xff]   ;;  %vm200_vm2 = vcmask 781312  }
   0x2   :  { %21 = vst.msk [vmem:[#allocation2 + $0x8] sm:$0xff] %vm19_vm1, %v266_v1  ;;  %23 = vst.msk [vmem:[#allocation2 + $0x18] sm:$0xff] %vm19_vm1, %v266_v1  ;;  %251 = vmatprep.subr.msk.bf16.mxu0 %vm84_vm0, %v258_v0  ;;  %v92_v3 = vsel %vm84_vm0, %v258_v0, 0  ;;  %v264_v4 = vld [vmem:[%s349_s0] sm:$0xff]   ;;  %v95_v5 = vsel %vm84_vm0, %v259_v2, 0  ;;  %v260_v6 = vld [vmem:[%s348_s1 + $0x10] sm:$0xff]  }
   0x3   :  { %236 = vmatpush3.bf16.xpose.msra.mxu0 %v92_v3  ;;  %247 = vmatprep.mubr.msk.bf16.mxu0 %vm84_vm0, %v264_v4  ;;  %v98_v7 = vsel %vm84_vm0, %v260_v6, 0  ;;  %v261_v8 = vld [vmem:[%s348_s1 + $0x18] sm:$0xff]   ;;  %v262_v10 = vld [vmem:[%s348_s1 + $0x20] sm:$0xff]   ;;  %v263_v12 = vld [vmem:[%s348_s1 + $0x28] sm:$0xff]   ;;  %v177_v17 = vshrl.u32 %v176_v15, 7 }
   0x4   :  { %252 = vmatprep.subr.msk.bf16.mxu0 %vm84_vm0, %v259_v2  ;;  %v101_v9 = vsel %vm84_vm0, %v261_v8, 0  ;;  %v104_v11 = vsel %vm84_vm0, %v262_v10, 0  ;;  %v107_v13 = vsel %vm84_vm0, %v263_v12, 0  ;;  %v265_v14 = vld [vmem:[%s349_s0 + $0x8] sm:$0xff]   ;;  %v174_v20 = vld [vmem:[%s350_s2] sm:$0x1] }
   0x5   :  { %v175_v27 = vunpack.c.l.bf16 %v174_v20  ;;  %v178_v28 = vsub.s32 0, %v177_v17 }
   0x7   :  { %v179_v32 = vrot.slane %v175_v27, %v178_v28 }
   0x8   :  { %v26_v16 = vld [vmem:[#allocation2 + $0x10] sm:$0xff]  ;;  %v24_v18 = vld [vmem:[#allocation2] sm:$0xff] }
   0x9   :  { %v27_v21 = vld [vmem:[#allocation2 + $0x18] sm:$0xff]  ;;  %v25_v24 = vld [vmem:[#allocation2 + $0x8] sm:$0xff] }
   0xb   :  { %238 = vmatpush3.bf16.xpose.msra.mxu0 %v95_v5 }
   0xc   :  { %253 = vmatprep.subr.msk.bf16.mxu0 %vm84_vm0, %v260_v6 }
  0x13   :  { %240 = vmatpush3.bf16.xpose.msra.mxu0 %v98_v7 }
  0x14   :  { %254 = vmatprep.subr.msk.bf16.mxu0 %vm84_vm0, %v261_v8 }
  0x1b   :  { %242 = vmatpush3.bf16.xpose.msra.mxu0 %v101_v9 }
  0x1c   :  { %255 = vmatprep.subr.msk.bf16.mxu0 %vm84_vm0, %v262_v10 }
  0x23   :  { %244 = vmatpush3.bf16.xpose.msra.mxu0 %v104_v11 }
  0x24   :  { %256 = vmatprep.subr.msk.bf16.mxu0 %vm84_vm0, %v263_v12 }
  0x2b   :  { %246 = vmatpush3.bf16.xpose.msra.mxu0 %v107_v13 }
  0x32   :  { %248 = vmatmul.mubr.msk.bf16.vlgmr.msra.gmra.mrb[0].mxu0 %vm84_vm0, %v265_v14 }
 0x105   :  { %v249_v19 = vpop.f32.mrb[0].mxu0 }
 0x106   :  { %v160_v22 = vadd.f32 %v249_v19, %v26_v16  ;;  %v143_v23 = vpop.f32.mrb[1].mxu0 }
 0x107   :  { %v158_v25 = vadd.f32 %v143_v23, %v24_v18  ;;  %v250_v26 = vpop.f32.mrb[2].mxu0 }
 0x108   :  { %165 = vst.msk [vmem:[#allocation2 + $0x10] sm:$0xff] %vm19_vm1, %v160_v22  ;;  %v161_v29 = vadd.f32 %v250_v26, %v27_v21  ;;  %v146_v30 = vpop.f32.mrb[3].mxu0 }
 0x109   :  { %163 = vst.msk [vmem:[#allocation2] sm:$0xff] %vm19_vm1, %v158_v25  ;;  %v159_v31 = vadd.f32 %v146_v30, %v25_v24 }
 0x10a   :  { %166 = vst.msk [vmem:[#allocation2 + $0x18] sm:$0xff] %vm19_vm1, %v161_v29 }
 0x10b   :  { %164 = vst.msk [vmem:[#allocation2 + $0x8] sm:$0xff] %vm19_vm1, %v159_v31 }
 0x10f   :  { %v172_v33 = vld [vmem:[#allocation2 + $0x10] sm:$0xff] }
 0x110   :  { %v182_v34 = vadd.f32 %v179_v32, %v172_v33  ;;  %v170_v35 = vld [vmem:[#allocation2] sm:$0xff] }
 0x111   :  { %v180_v36 = vadd.f32 %v179_v32, %v170_v35  ;;  %v173_v37 = vld [vmem:[#allocation2 + $0x18] sm:$0xff] }
 0x112   :  { %v225_v38 = vpack.c.bf16 %v182_v34, %v182_v34  ;;  %v183_v39 = vadd.f32 %v179_v32, %v173_v37  ;;  %v171_v40 = vld [vmem:[#allocation2 + $0x8] sm:$0xff] }
 0x113   :  { %v223_v41 = vpack.c.bf16 %v180_v36, %v180_v36  ;;  %v181_v42 = vadd.f32 %v179_v32, %v171_v40 }
 0x114   :  { %203 = vst.msk [vmem:[%s351_s3 + $0x8] sm:$0xf] %vm200_vm2, %v225_v38  ;;  %v226_v43 = vpack.c.bf16 %v183_v39, %v183_v39 }
 0x115   :  { %201 = vst.msk [vmem:[%s351_s3] sm:$0xf] %vm200_vm2, %v223_v41  ;;  %v224_v44 = vpack.c.bf16 %v181_v42, %v181_v42 }
 0x116   :  { %204 = vst.msk [vmem:[%s351_s3 + $0xc] sm:$0xf] %vm200_vm2, %v226_v43 }
 0x117   :  { %202 = vst.msk [vmem:[%s351_s3 + $0x4] sm:$0xf] %vm200_vm2, %v224_v44 }

// kernel: mha_fa3_forward.4
= control target key start
LH: loop header
LB: loop body
LE: loop exit
PB: predicated region body
PF: predicated region fallthrough
CT: control target
= control target key end

     0   :  { %s1057_s22 = smov 0   ;;  %s1059_s23 = smov 0   ;;  %s1137_s0 = inlined_call_operand.<no memory space> [shape: s32[1], index: 0, kind: input, shape index: {}, may-alias: {0,1}]   ;;  %s1138_s1 = inlined_call_operand.<no memory space> [shape: s32[1], index: 1, kind: input, shape index: {}, may-alias: {0,1}]   ;;  %s1139_s2 = inlined_call_operand.vmem [shape: bf16[8,16,8], index: 2, kind: input, shape index: {}]   ;;  %s1140_s3 = inlined_call_operand.vmem [shape: bf16[8,16,8], index: 3, kind: input, shape index: {}]   ;;  %s1141_s4 = inlined_call_operand.vmem [shape: bf16[8,16,8], index: 4, kind: input, shape index: {}]   ;;  %s1142_s5 = inlined_call_operand.vmem [shape: bf16[8,16,8], index: 5, kind: output, shape index: {}]  }
   0x1   :  { %10 = sst [smem:[#allocation7]] %s1137_s0  ;;  %s1061_s24 = smov 0  }
   0x2   :  { %11 = sst [smem:[#allocation8]] %s1138_s1 }
   0x3 LB: > { %s29_s0 = sadd.s32 1, %s1007_s23  ;;  %p866_p0 = scmp.ge.s32.totalorder %s1011_s24, 1  ;;  %s1011_s24 = sphi %s1061_s24, %s17_s24   ;;  %s1007_s23 = sphi %s1059_s23, %s1144_s23   ;;  %s1003_s22 = sphi %s1057_s22, %s1143_s22  }
   0x4   : > { %p31_p1 = scmp.ge.s32.totalorder %s29_s0, 8  ;;  %p210_p2 = scmp.lt.s32.totalorder %s1011_s24, 9 }
   0x6   : > { %s1146_s0 = smov (%p31_p1, %s29_s0), 0  ;;  %p211_p3 = pnand %p866_p0, %p210_p2 }
   0x7   : > { %s1075_s1 = sld [smem:[#allocation7]] (!%p211_p3)  ;;  %p266_p4 = scmp.lt.s32.totalorder (!%p211_p3), %s1003_s22, 7 }
   0x8   : > { %214 = sbr.rel (%p211_p3) target bundleno = 1569 (0x621), region = 32  ;;  %s1077_s25 = sld [smem:[#allocation8]] (!%p211_p3) }
   0xd   : > { %s867_s26 = sshll.u32 (!%p211_p3), %s1075_s1, 1 }
   0xe   : > { %p268_p5 = scmp.lt.s32.totalorder (!%p211_p3), %s867_s26, 1  ;;  %s870_s27 = sshll.u32 (!%p211_p3), %s1077_s25, 1 }
   0xf   : > { %s1148_s22 = smov (!%p266_p4, %s1003_s22), 7  ;;  %p280_p6 = scmp.lt.s32.totalorder %s870_s27, 1 }
  0x10   : > { %s868_s28 = sshll.u32 %s1148_s22, 1  ;;  %s1150_s26 = smov (!%p268_p5, %s867_s26), 1 }
  0x11   : > { %s1152_s27 = smov (!%p280_p6, %s870_s27), 1  ;;  %s271_s29 = sadd.s32 %s868_s28, %s1150_s26 }
  0x12   : > { %s869_s30 = sshll.u32 %s271_s29, 2  ;;  %s283_s6 = sadd.s32 %s868_s28, %s1152_s27 }
  0x13   : > { %s273_s9 = scalar_lea.vmem %s1139_s2, %s869_s30  ;;  %s872_s10 = sshll.u32 %s283_s6, 2 }
  0x14   : > { %s1087_s13 = scalar_lea.vmem %s1140_s3, %s872_s10  ;;  %s1092_s16 = scalar_lea.vmem %s1141_s4, %s872_s10 }
  0x15   : > { %s1097_s19 = scalar_lea.vmem %s1142_s5, %s869_s30  ;;  %p879_p7 = scmp.ne.s32.totalorder %s1077_s25, 0 }
  0x16   : > { %v320_v0 = vld [vmem:[%s273_s9] sm:$0xf] (!%p879_p7)  ;;  %v321_v1 = vld [vmem:[%s273_s9 + $0x4] sm:$0xf] (!%p879_p7)  ;;  %vm330_vm0 = vcmask (!%p879_p7), 64512   ;;  %v1013_v4 = vmov (!%p879_p7), 0.0  }
  0x17   : > { %319 = sbr.rel (%p879_p7) target bundleno = 30 (0x1e), region = 36  ;;  %v322_v2 = vmul.bf16 (!%p879_p7), 1052065461, %v320_v0  ;;  %v323_v3 = vmul.bf16 (!%p879_p7), 1052065461, %v321_v1  ;;  %334 = vst [vmem:[#allocation4] sm:$0xff] (!%p879_p7), %v1013_v4 }
  0x18   : > { %335 = vst [vmem:[#allocation4 + $0x8] sm:$0xff] (!%p879_p7), %v1013_v4  ;;  %336 = vst.msk [vmem:[#allocation5] sm:$0xff] (!%p879_p7), %vm330_vm0, %v1013_v4  ;;  %v1014_v5 = vmov (!%p879_p7), -1e+30  }
  0x19   : > { %337 = vst.msk [vmem:[#allocation5 + $0x8] sm:$0xff] (!%p879_p7), %vm330_vm0, %v1013_v4  ;;  %332 = vst [vmem:[#allocation3] sm:$0xff] (!%p879_p7), %v1014_v5  ;;  %v880_v6 = vcombine.low (!%p879_p7), %v322_v2, %v323_v3 }
  0x1a   : > { %333 = vst [vmem:[#allocation3 + $0x8] sm:$0xff] (!%p879_p7), %v1014_v5 }
  0x1b   : > { %331 = vst.msk [vmem:[#allocation2] sm:$0xff] (!%p879_p7), %vm330_vm0, %v880_v6 }
  0x1e PF: > { %p881_p8 = scmp.eq.s32.totalorder %s1077_s25, %s1075_s1 }
  0x1f   : > { %v963_v7 = vld [vmem:[%s1087_s13] sm:$0xff] (!%p881_p8)   ;;  %v1015_v8 = vmov (!%p881_p8), 0.0   ;;  %vm352_vm1 = vcmask (!%p881_p8), 64512   ;;  %vm1016_vm2 = vmmov (!%p881_p8), 0   ;;  %vm404_vm3 = vcmask (!%p881_p8), 130048   ;;  %v402_v42 = vld [vmem:[#allocation4] sm:$0xff] (!%p881_p8) }
  0x20   : > { %341 = sbr.rel (%p881_p8) target bundleno = 764 (0x2fc), region = 40  ;;  %905 = vmatprep.subr.bf16.mxu0 (!%p881_p8), %v1015_v8  ;;  %911 = vmatprep.subr.bf16.mxu1 (!%p881_p8), %v1015_v8  ;;  %v357_v9 = vsel (!%p881_p8), %vm352_vm1, %v963_v7, 0  ;;  %v1017_v17 = vmov (!%p881_p8), 0   ;;  %v400_v18 = vld [vmem:[#allocation3] sm:$0xff] (!%p881_p8)  ;;  %v964_v26 = vld [vmem:[%s1092_s16] sm:$0xff] (!%p881_p8)   ;;  %v448_v52 = vld [vmem:[#allocation5 + $0x8] sm:$0xff] (!%p881_p8) }
  0x21   : > { %907 = vmatprep.mubr.msk.bf16.mxu0 (!%p881_p8), %vm1016_vm2, %v1015_v8  ;;  %913 = vmatprep.mubr.msk.bf16.mxu1 (!%p881_p8), %vm1016_vm2, %v1015_v8  ;;  %v401_v21 = vld [vmem:[#allocation3 + $0x8] sm:$0xff] (!%p881_p8)  ;;  %v403_v45 = vld [vmem:[#allocation4 + $0x8] sm:$0xff] (!%p881_p8)  ;;  %v447_v50 = vld [vmem:[#allocation5] sm:$0xff] (!%p881_p8) }
  0x22   : > { %906 = vmatpush3.bf16.xpose.msra.mxu0 (!%p881_p8), %v357_v9  ;;  %v342_v10 = vld [vmem:[#allocation2] sm:$0xff] (!%p881_p8)  ;;  %961 = vset.pattern.permute.xlu1 (!%p881_p8), %v1017_v17 }
  0x23   : > { %962 = vset.pattern.permute.xlu0 (!%p881_p8), %v1017_v17  ;;  %912 = vmatpush3.bf16.msra.mxu1 (!%p881_p8), %v964_v26 }
  0x29   : > { %908 = vmatmul.mubr.msk.bf16.vlgmr.msra.gmra.mrb[0].mxu0 %vm352_vm1, %v342_v10 }
  0xfc   : > { %v393_v11 = vpop.f32.mrb[0].mxu0 }
  0xfd   : > { %v909_v12 = vpop.f32.mrb[1].mxu0  ;;  %v405_v13 = vsel %vm404_vm3, %v393_v11, -inf }
  0xfe   : > { %406 = vmax.xlane.f32.xlu0 %v405_v13  ;;  %v396_v14 = vpop.f32.mrb[2].mxu0 }
  0xff   : > { %v910_v15 = vpop.f32.mrb[3].mxu0  ;;  %v408_v16 = vsel %vm404_vm3, %v396_v14, -inf }
 0x102   : > { %409 = vmax.xlane.f32.xlu0 %v408_v16 }
 0x18b   : > { %v407_v19 = vpop.xlane.xlu0 %406 }
 0x18c   : > { %v411_v20 = vmax.f32 %v400_v18, %v407_v19 }
 0x18e   : > { %v413_v22 = vsub.f32 %v400_v18, %v411_v20  ;;  %516 = vst [vmem:[#allocation3] sm:$0xff] %v411_v20  ;;  %421 = vperm.xlu1 %961, %v411_v20  }
 0x18f   : > { %v410_v23 = vpop.xlane.xlu0 %409 }
 0x190   : > { %v412_v24 = vmax.f32 %v401_v21, %v410_v23  ;;  %v415_v39 = vmul.f32 1.442695, %v413_v22 }
 0x192   : > { %v414_v25 = vsub.f32 %v401_v21, %v412_v24  ;;  %517 = vst [vmem:[#allocation3 + $0x8] sm:$0xff] %v412_v24  ;;  %426 = vperm.xlu1 %961, %v412_v24  }
 0x194   : > { %v417_v38 = vmul.f32 1.442695, %v414_v25 }
 0x20d   : > { %v422_v27 = vpop.permute.xlu1 %421 }
 0x20e   : > { %v429_v28 = vsub.f32 %v393_v11, %v422_v27 }
 0x210   : > { %v431_v29 = vmul.f32 1.442695, %v429_v28 }
 0x211   : > { %v427_v30 = vpop.permute.xlu1 %426 }
 0x212   : > { %965 = vpow2.f32 %v431_v29  ;;  %v430_v31 = vsub.f32 %v396_v14, %v427_v30 }
 0x214   : > { %v433_v32 = vmul.f32 1.442695, %v430_v31 }
 0x216   : > { %967 = vpow2.f32 %v433_v32 }
 0x217   : > { %969 = vpow2.f32 %v417_v38 }
 0x218   : > { %971 = vpow2.f32 %v415_v39 }
 0x21c   : > { %v966_v33 = vpop.eup %965 }
 0x21d   : > { %v437_v34 = vsel %vm404_vm3, %v966_v33, 0.0 }
 0x21e   : > { %438 = vadd.xlane.f32.xlu0 %v437_v34 }
 0x220   : > { %v968_v35 = vpop.eup %967 }
 0x221   : > { %v440_v36 = vsel %vm404_vm3, %v968_v35, 0.0  ;;  %v461_v37 = vpack.c.bf16 %v968_v35, %v966_v33  ;;  %v970_v40 = vpop.eup %969 }
 0x222   : > { %441 = vadd.xlane.f32.xlu1 %v440_v36  ;;  %v972_v41 = vpop.eup %971  ;;  %v436_v47 = vmul.f32 %v970_v40, %v403_v45 }
 0x223   : > { %914 = vmatmul.mubr.msk.bf16.vlgmr.msra.gmra.mrb[0].mxu1 %vm404_vm3, %v461_v37  ;;  %v435_v43 = vmul.f32 %v972_v41, %v402_v42 }
 0x233   : > { %456 = vperm.xlu1 %961, %v970_v40  }
 0x234   : > { %451 = vperm.xlu0 %962, %v972_v41  }
 0x2ab   : > { %v439_v44 = vpop.xlane.xlu0 %438 }
 0x2ac   : > { %v443_v46 = vadd.f32 %v439_v44, %v435_v43 }
 0x2ae   : > { %445 = vst [vmem:[#allocation4] sm:$0xff] %v443_v46 }
 0x2af   : > { %v442_v48 = vpop.xlane.xlu1 %441 }
 0x2b0   : > { %v444_v49 = vadd.f32 %v442_v48, %v436_v47 }
 0x2b2   : > { %446 = vst [vmem:[#allocation4 + $0x8] sm:$0xff] %v444_v49 }
 0x2b3   : > { %v452_v51 = vpop.permute.xlu0 %451  ;;  %v457_v53 = vpop.permute.xlu1 %456 }
 0x2b4   : > { %v459_v54 = vmul.f32 %v452_v51, %v447_v50  ;;  %v460_v56 = vmul.f32 %v457_v53, %v448_v52 }
 0x2f6   : > { %v505_v55 = vpop.f32.mrb[0].mxu1 }
 0x2f7   : > { %v512_v57 = vadd.f32 %v505_v55, %v459_v54  ;;  %v915_v58 = vpop.f32.mrb[1].mxu1 }
 0x2f8   : > { %v508_v59 = vpop.f32.mrb[2].mxu1 }
 0x2f9   : > { %514 = vst.msk [vmem:[#allocation5] sm:$0xff] %vm352_vm1, %v512_v57  ;;  %v513_v60 = vadd.f32 %v508_v59, %v460_v56  ;;  %v916_v61 = vpop.f32.mrb[3].mxu1 }
 0x2fb   : > { %515 = vst.msk [vmem:[#allocation5 + $0x8] sm:$0xff] %vm352_vm1, %v513_v60 }
 0x2fc PF: > { %p886_p9 = scmp.ne.s32.totalorder %s1077_s25, %s1075_s1 }
 0x2fd   : > { %v975_v62 = vld [vmem:[%s1087_s13] sm:$0xff] (!%p886_p9)   ;;  %v1018_v63 = vmov (!%p886_p9), 0.0   ;;  %vm532_vm4 = vcmask (!%p886_p9), 64512   ;;  %vm1019_vm5 = vmmov (!%p886_p9), 0   ;;  %v580_v2 = vlaneseq (!%p886_p9)  ;;  %v589_v15 = vld [vmem:[#allocation3] sm:$0xff] (!%p886_p9)  ;;  %v590_v18 = vld [vmem:[#allocation3 + $0x8] sm:$0xff] (!%p886_p9) }
 0x2fe   : > { %521 = sbr.rel (%p886_p9) target bundleno = 1569 (0x621), region = 44  ;;  %917 = vmatprep.subr.bf16.mxu0 (!%p886_p9), %v1018_v63  ;;  %923 = vmatprep.subr.bf16.mxu1 (!%p886_p9), %v1018_v63  ;;  %v537_v0 = vsel (!%p886_p9), %vm532_vm4, %v975_v62, 0  ;;  %v522_v1 = vld [vmem:[#allocation2] sm:$0xff] (!%p886_p9)  ;;  %vm593_vm7 = vcmask (!%p886_p9), 130048   ;;  %v1020_v14 = vmov (!%p886_p9), 0   ;;  %v591_v39 = vld [vmem:[#allocation4] sm:$0xff] (!%p886_p9) }
 0x2ff   : > { %919 = vmatprep.mubr.msk.bf16.mxu0 (!%p886_p9), %vm1019_vm5, %v1018_v63  ;;  %925 = vmatprep.mubr.msk.bf16.mxu1 (!%p886_p9), %vm1019_vm5, %v1018_v63  ;;  %v581_v3 = vshrl.u32 (!%p886_p9), %v580_v2, 7  ;;  %v584_v4 = vand.u32 (!%p886_p9), 127, %v580_v2  ;;  %v976_v23 = vld [vmem:[%s1092_s16] sm:$0xff] (!%p886_p9)   ;;  %vm733_vm9 = vcmask (!%p886_p9), 60416  }
 0x300   : > { %918 = vmatpush3.bf16.xpose.msra.mxu0 (!%p886_p9), %v537_v0  ;;  %973 = vset.pattern.permute.xlu1 (!%p886_p9), %v1020_v14  ;;  %v592_v42 = vld [vmem:[#allocation4 + $0x8] sm:$0xff] (!%p886_p9)  ;;  %v636_v49 = vld [vmem:[#allocation5] sm:$0xff] (!%p886_p9) }
 0x301   : > { %v582_v5 = vadd.s32 (!%p886_p9), 8, %v581_v3  ;;  %vm585_vm6 = vcmp.ge.s32.totalorder (!%p886_p9), %v581_v3, %v584_v4  ;;  %974 = vset.pattern.permute.xlu0 (!%p886_p9), %v1020_v14  ;;  %924 = vmatpush3.bf16.msra.mxu1 (!%p886_p9), %v976_v23 }
 0x302   : > { %v637_v51 = vld [vmem:[#allocation5 + $0x8] sm:$0xff] (!%p886_p9) }
 0x303   : > { %vm586_vm8 = vcmp.ge.s32.totalorder (!%p886_p9), %v582_v5, %v584_v4 }
 0x307   : > { %920 = vmatmul.mubr.msk.bf16.vlgmr.msra.gmra.mrb[0].mxu0 %vm532_vm4, %v522_v1 }
 0x3da   : > { %v573_v6 = vpop.f32.mrb[0].mxu0 }
 0x3db   : > { %v587_v7 = vsel %vm585_vm6, %v573_v6, -1e+30  ;;  %v921_v8 = vpop.f32.mrb[1].mxu0 }
 0x3dc   : > { %v576_v9 = vpop.f32.mrb[2].mxu0  ;;  %v594_v10 = vsel %vm593_vm7, %v587_v7, -inf }
 0x3dd   : > { %v588_v11 = vsel %vm586_vm8, %v576_v9, -1e+30  ;;  %595 = vmax.xlane.f32.xlu0 %v594_v10  ;;  %v922_v12 = vpop.f32.mrb[3].mxu0 }
 0x3de   : > { %v597_v13 = vsel %vm593_vm7, %v588_v11, -inf }
 0x3e1   : > { %598 = vmax.xlane.f32.xlu0 %v597_v13 }
 0x46a   : > { %v596_v16 = vpop.xlane.xlu0 %595 }
 0x46b   : > { %v600_v17 = vmax.f32 %v589_v15, %v596_v16 }
 0x46d   : > { %v602_v19 = vsub.f32 %v589_v15, %v600_v17  ;;  %705 = vst [vmem:[#allocation3] sm:$0xff] %v600_v17  ;;  %610 = vperm.xlu1 %973, %v600_v17  }
 0x46e   : > { %v599_v20 = vpop.xlane.xlu0 %598 }
 0x46f   : > { %v601_v21 = vmax.f32 %v590_v18, %v599_v20  ;;  %v604_v36 = vmul.f32 1.442695, %v602_v19 }
 0x471   : > { %v603_v22 = vsub.f32 %v590_v18, %v601_v21  ;;  %706 = vst [vmem:[#allocation3 + $0x8] sm:$0xff] %v601_v21  ;;  %615 = vperm.xlu1 %973, %v601_v21  }
 0x473   : > { %v606_v35 = vmul.f32 1.442695, %v603_v22 }
 0x4ec   : > { %v611_v24 = vpop.permute.xlu1 %610 }
 0x4ed   : > { %v618_v25 = vsub.f32 %v587_v7, %v611_v24 }
 0x4ef   : > { %v620_v26 = vmul.f32 1.442695, %v618_v25 }
 0x4f0   : > { %v616_v27 = vpop.permute.xlu1 %615 }
 0x4f1   : > { %977 = vpow2.f32 %v620_v26  ;;  %v619_v28 = vsub.f32 %v588_v11, %v616_v27 }
 0x4f3   : > { %v622_v29 = vmul.f32 1.442695, %v619_v28 }
 0x4f5   : > { %979 = vpow2.f32 %v622_v29 }
 0x4f6   : > { %981 = vpow2.f32 %v606_v35 }
 0x4f7   : > { %983 = vpow2.f32 %v604_v36 }
 0x4fb   : > { %v978_v30 = vpop.eup %977 }
 0x4fc   : > { %v626_v31 = vsel %vm593_vm7, %v978_v30, 0.0 }
 0x4fd   : > { %627 = vadd.xlane.f32.xlu0 %v626_v31 }
 0x4ff   : > { %v980_v32 = vpop.eup %979 }
 0x500   : > { %v629_v33 = vsel %vm593_vm7, %v980_v32, 0.0  ;;  %v650_v34 = vpack.c.bf16 %v980_v32, %v978_v30  ;;  %v982_v37 = vpop.eup %981 }
 0x501   : > { %630 = vadd.xlane.f32.xlu1 %v629_v33  ;;  %v984_v38 = vpop.eup %983  ;;  %v625_v44 = vmul.f32 %v982_v37, %v592_v42 }
 0x502   : > { %926 = vmatmul.mubr.msk.bf16.vlgmr.msra.gmra.mrb[0].mxu1 %vm593_vm7, %v650_v34  ;;  %v624_v40 = vmul.f32 %v984_v38, %v591_v39 }
 0x512   : > { %645 = vperm.xlu1 %973, %v982_v37  }
 0x513   : > { %640 = vperm.xlu0 %974, %v984_v38  }
 0x58a   : > { %v628_v41 = vpop.xlane.xlu0 %627 }
 0x58b   : > { %v632_v43 = vadd.f32 %v628_v41, %v624_v40 }
 0x58d   : > { %634 = vst [vmem:[#allocation4] sm:$0xff] %v632_v43  ;;  %985 = vrcp.f32 %v632_v43 }
 0x58e   : > { %v631_v45 = vpop.xlane.xlu1 %630 }
 0x58f   : > { %v633_v46 = vadd.f32 %v631_v45, %v625_v44 }
 0x591   : > { %635 = vst [vmem:[#allocation4 + $0x8] sm:$0xff] %v633_v46  ;;  %987 = vrcp.f32 %v633_v46 }
 0x592   : > { %v641_v50 = vpop.permute.xlu0 %640  ;;  %v646_v52 = vpop.permute.xlu1 %645 }
 0x593   : > { %v648_v53 = vmul.f32 %v641_v50, %v636_v49  ;;  %v649_v55 = vmul.f32 %v646_v52, %v637_v51 }
 0x597   : > { %v986_v47 = vpop.eup %985 }
 0x598   : > { %715 = vperm.xlu0 %974, %v986_v47  }
 0x59b   : > { %v988_v48 = vpop.eup %987 }
 0x59c   : > { %720 = vperm.xlu0 %974, %v988_v48  }
 0x5d5   : > { %v694_v54 = vpop.f32.mrb[0].mxu1 }
 0x5d6   : > { %v701_v56 = vadd.f32 %v694_v54, %v648_v53  ;;  %v927_v57 = vpop.f32.mrb[1].mxu1 }
 0x5d7   : > { %v697_v58 = vpop.f32.mrb[2].mxu1 }
 0x5d8   : > { %703 = vst.msk [vmem:[#allocation5] sm:$0xff] %vm532_vm4, %v701_v56  ;;  %v702_v59 = vadd.f32 %v697_v58, %v649_v55  ;;  %v928_v60 = vpop.f32.mrb[3].mxu1 }
 0x5da   : > { %704 = vst.msk [vmem:[#allocation5 + $0x8] sm:$0xff] %vm532_vm4, %v702_v59 }
 0x5df   : > { %v711_v61 = vld [vmem:[#allocation5] sm:$0xff] }
 0x5e1   : > { %v712_v1 = vld [vmem:[#allocation5 + $0x8] sm:$0xff] }
 0x617   : > { %v716_v62 = vpop.permute.xlu0 %715 }
 0x618   : > { %v723_v63 = vmul.f32 %v716_v62, %v711_v61 }
 0x61a   : > { %v895_v0 = vpack.c.bf16 %v723_v63, %v723_v63 }
 0x61b   : > { %v721_v2 = vpop.permute.xlu0 %720 }
 0x61c   : > { %734 = vst.msk [vmem:[%s1097_s19] sm:$0xf] %vm733_vm9, %v895_v0  ;;  %v724_v3 = vmul.f32 %v721_v2, %v712_v1 }
 0x61e   : > { %v896_v4 = vpack.c.bf16 %v724_v3, %v724_v3 }
 0x620   : > { %735 = vst.msk [vmem:[%s1097_s19 + $0x4] sm:$0xf] %vm733_vm9, %v896_v4 }
 0x621 PF: > { %s17_s24 = sadd.s32 1, %s1011_s24   ;;  %s1143_s22 = smov %s1007_s23 }
 0x622   : > { %p14_p10 = scmp.ge.s32.totalorder %s17_s24, 10   ;;  %s1144_s23 = smov %s1146_s0 }
 0x624   :  { %16 = sbr.rel (!%p14_p10) target bundleno = 3 (0x3), region = 80 }

// kernel: mha_fa3_forward.5
= control target key start
LH: loop header
LB: loop body
LE: loop exit
PB: predicated region body
PF: predicated region fallthrough
CT: control target
= control target key end

     0   :  { %vm20_vm0 = vcmask 261120   ;;  %v241_v4 = vmov 0.0   ;;  %s306_s0 = inlined_call_operand.vmem [shape: bf16[32,32], index: 0, kind: input, shape index: {}]   ;;  %s307_s1 = inlined_call_operand.vmem [shape: bf16[32,32], index: 1, kind: input, shape index: {}]   ;;  %s308_s2 = inlined_call_operand.vmem [shape: bf16[1,32], index: 2, kind: input, shape index: {}]   ;;  %s309_s3 = inlined_call_operand.hbm [shape: bf16[32,32], index: 3, kind: output, shape index: {}]  }
   0x1   :  { %v213_v0 = vld [vmem:[%s307_s1] sm:$0xff]   ;;  %v214_v1 = vld [vmem:[%s307_s1 + $0x8] sm:$0xff]   ;;  %23 = vst.msk [vmem:[#allocation2 + $0x10] sm:$0xff] %vm20_vm0, %v241_v4  ;;  %21 = vst.msk [vmem:[#allocation2] sm:$0xff] %vm20_vm0, %v241_v4 }
   0x2   :  { %207 = vmatprep.subr.msk.bf16.mxu0 %vm20_vm0, %v213_v0  ;;  %v65_v2 = vsel %vm20_vm0, %v213_v0, 0  ;;  %v215_v3 = vld [vmem:[%s306_s0] sm:$0xff]   ;;  %22 = vst.msk [vmem:[#allocation2 + $0x8] sm:$0xff] %vm20_vm0, %v241_v4  ;;  %24 = vst.msk [vmem:[#allocation2 + $0x18] sm:$0xff] %vm20_vm0, %v241_v4 }
   0x3   :  { %200 = vmatpush3.bf16.xpose.msra.mxu0 %v65_v2  ;;  %203 = vmatprep.mubr.msk.bf16.mxu0 %vm20_vm0, %v215_v3 }
   0x4   :  { %208 = vmatprep.subr.msk.bf16.mxu0 %vm20_vm0, %v214_v1 }
   0x5   :  { %8 = vsyncpa [#allocation4], 0  ;;  %v68_v5 = vsel %vm20_vm0, %v214_v1, 0  ;;  %v216_v6 = vld [vmem:[%s306_s0 + $0x8] sm:$0xff]   ;;  %v136_v7 = vlaneseq  ;;  %v134_v13 = vld [vmem:[%s308_s2] sm:$0x1] }
   0x6   :  { %v135_v21 = vunpack.c.l.bf16 %v134_v13  ;;  %vm160_vm1 = vcmask 257024   ;;  %s242_s0 = smov [#allocation3]  }
   0x7   :  { %v137_v10 = vshrl.u32 %v136_v7, 7  ;;  %s170_s2 = sshll.u32 %s242_s0, 4  ;;  %s171_s2 = int_to_ptr.vmem [resolvable:$true] %s170_s2 }
   0x8   :  { %v27_v8 = vld [vmem:[#allocation2 + $0x10] sm:$0xff]  ;;  %v25_v9 = vld [vmem:[#allocation2] sm:$0xff]  ;;  %s217_s21 = scalar_lea.vmem %s171_s2, 256  ;;  %p222_p1 = scmp.lt.s32.totalorder %s171_s2, %s171_s2 }
   0x9   :  { %v28_v12 = vld [vmem:[#allocation2 + $0x18] sm:$0xff]  ;;  %v26_v16 = vld [vmem:[#allocation2 + $0x8] sm:$0xff]  ;;  %v138_v22 = vsub.s32 0, %v137_v10  ;;  %p218_p0 = scmp.ne.s32.totalorder %s171_s2, %s217_s21  ;;  %p223_p2 = scmp.lt.s32.totalorder %s217_s21, %s217_s21 }
   0xb   :  { %202 = vmatpush3.bf16.xpose.msra.mxu0 %v68_v5  ;;  %v139_v24 = vrot.slane %v135_v21, %v138_v22  ;;  %p224_p3 = por %p223_p2, %p222_p1 }
   0xd   :  { %p225_p4 = pnand %p224_p3, %p218_p0 }
  0x12   :  { %204 = vmatmul.mubr.msk.bf16.vlgmr.msra.gmra.mrb[0].mxu0 %vm20_vm0, %v216_v6 }
  0xe5   :  { %v205_v11 = vpop.f32.mrb[0].mxu0 }
  0xe6   :  { %v121_v14 = vadd.f32 %v205_v11, %v27_v8  ;;  %v104_v15 = vpop.f32.mrb[1].mxu0 }
  0xe7   :  { %v119_v17 = vadd.f32 %v104_v15, %v25_v9  ;;  %v206_v18 = vpop.f32.mrb[2].mxu0 }
  0xe8   :  { %125 = vst.msk [vmem:[#allocation2 + $0x10] sm:$0xff] %vm20_vm0, %v121_v14  ;;  %v122_v19 = vadd.f32 %v206_v18, %v28_v12  ;;  %v107_v20 = vpop.f32.mrb[3].mxu0 }
  0xe9   :  { %123 = vst.msk [vmem:[#allocation2] sm:$0xff] %vm20_vm0, %v119_v17  ;;  %v120_v23 = vadd.f32 %v107_v20, %v26_v16 }
  0xea   :  { %126 = vst.msk [vmem:[#allocation2 + $0x18] sm:$0xff] %vm20_vm0, %v122_v19 }
  0xeb   :  { %124 = vst.msk [vmem:[#allocation2 + $0x8] sm:$0xff] %vm20_vm0, %v120_v23 }
  0xef   :  { %v132_v25 = vld [vmem:[#allocation2 + $0x10] sm:$0xff] }
  0xf0   :  { %v130_v26 = vld [vmem:[#allocation2] sm:$0xff]  ;;  %v142_v27 = vadd.f32 %v139_v24, %v132_v25 }
  0xf1   :  { %v133_v28 = vld [vmem:[#allocation2 + $0x18] sm:$0xff]  ;;  %v140_v29 = vadd.f32 %v139_v24, %v130_v26 }
  0xf2   :  { %v131_v30 = vld [vmem:[#allocation2 + $0x8] sm:$0xff]  ;;  %v143_v31 = vadd.f32 %v139_v24, %v133_v28  ;;  %v193_v32 = vpack.c.bf16 %v142_v27, %v142_v27 }
  0xf3   :  { %v141_v33 = vadd.f32 %v139_v24, %v131_v30  ;;  %v191_v34 = vpack.c.bf16 %v140_v29, %v140_v29 }
  0xf4   :  { %v194_v35 = vpack.c.bf16 %v143_v31, %v143_v31  ;;  %163 = vst.msk [vmem:[#allocation3 + $0x8] sm:$0xf] %vm160_vm1, %v193_v32 }
  0xf5   :  { %v192_v36 = vpack.c.bf16 %v141_v33, %v141_v33  ;;  %161 = vst.msk [vmem:[#allocation3] sm:$0xf] %vm160_vm1, %v191_v34 }
  0xf6   :  { %164 = vst.msk [vmem:[#allocation3 + $0xc] sm:$0xf] %vm160_vm1, %v194_v35 }
  0xf7   :  { %162 = vst.msk [vmem:[#allocation3 + $0x4] sm:$0xf] %vm160_vm1, %v192_v36 }
  0xf8   :  { %228 = shalt.err (!%p225_p4)
}
  0xf9   :  { %s229_s24 = scalar_lea.hbm %s309_s3, 256 }
  0xfa   :  { %p230_p5 = scmp.ne.s32.totalorder %s309_s3, %s229_s24  ;;  %p233_p6 = scmp.lt.u32.totalorder %s229_s24, %s309_s3 }
  0xfc   :  { %p235_p7 = pnand %p233_p6, %p230_p5 }
  0xfe   :  { %238 = shalt.err (!%p235_p7)
}
  0xff   :  { %s243_s29 = smov 64   ;;  %s244_s30 = smov 4  }
 0x100   :  { %176 = dma.vmem_to_hbm [thread:$0]  %s171_s2, 256, %s309_s3, [#allocation4], %s243_s29, %s243_s29, %s244_s30  }
 0x101   :  { %239 = dma.done.wait [#allocation4], 256  }
 0x102   :  { %240 = vsyncadd [#allocation4], 4294967040 }
 0x103   :  { %180 = vsyncpa [#allocation4], 1 }

</bundles_post_ra>
